<compile_context>
chip_gen: v6e
topology: v6e:2x2x1
jax: 0.10.0
libtpu: 0.0.40
codegen_flags: <defaults>
</compile_context>

<pallas_src>
import jax
import jax.numpy as jnp
from jax.experimental import pallas as pl
from jax.experimental.pallas import tpu as pltpu

_LANE = 128  # lane width: hidden dims padded 100 -> 128 (zero pads are exact)


def mlp_generator_kernel(x_ref, w1_ref, b1_ref, w2_ref, b2_ref, w3_ref, b3_ref,
                         o_ref):
    x = x_ref[...].astype(jnp.float32)

    # F.normalize(x, p=2, dim=-1): x * rsqrt(max(||x||^2, 1e-24))
    # == x / max(||x||_2, 1e-12). rsqrt goes to the EUP slot (free-ish).
    sumsq = jnp.sum(x * x, axis=-1, keepdims=True)
    x = x * jax.lax.rsqrt(jnp.maximum(sumsq, 1e-24))

    # Linear(16, 128pad) + LeakyReLU(0.01). K=16: keep f32 (perf-neutral,
    # tighter accuracy on the normalized input).
    h = jnp.dot(x, w1_ref[...], preferred_element_type=jnp.float32) + b1_ref[...]
    h = jnp.where(h > 0, h, 0.01 * h)

    # Linear(128pad, 128pad) + LeakyReLU(0.01): bf16 MXU inputs, f32 acc.
    h = jnp.dot(h.astype(jnp.bfloat16), w2_ref[...],
                preferred_element_type=jnp.float32) + b2_ref[...]
    h = jnp.where(h > 0, h, 0.01 * h)

    # Linear(128pad, 32) + Tanh — output stays 32 lanes (no padded lanes to
    # compute, store, or slice away afterwards).
    h = jnp.dot(h.astype(jnp.bfloat16), w3_ref[...],
                preferred_element_type=jnp.float32) + b3_ref[...]
    o_ref[...] = jnp.tanh(h).astype(o_ref.dtype)


def _pad_to(a, rows, cols):
    r, c = a.shape
    return jnp.pad(a, ((0, rows - r), (0, cols - c)))


def prepare_params(params):
    """One-time padding / casting of weights (hoisted out of the call path)."""
    in_dim = params["w1"].shape[0]
    out_dim = params["w3"].shape[1]
    return {
        "w1": _pad_to(params["w1"], in_dim, _LANE).astype(jnp.float32),  # (16,128)
        "b1": _pad_to(params["b1"], 1, _LANE).astype(jnp.float32),       # (1,128)
        "w2": _pad_to(params["w2"], _LANE, _LANE).astype(jnp.bfloat16),  # (128,128)
        "b2": _pad_to(params["b2"], 1, _LANE).astype(jnp.float32),       # (1,128)
        "w3": _pad_to(params["w3"], _LANE, out_dim).astype(jnp.bfloat16),# (128,32)
        "b3": params["b3"].astype(jnp.float32),                          # (1,32)
    }


def _tpu_generation_hints():
    """(batch-tile cap, tensorcores-per-chip) from the local device kind."""
    kind = ""
    try:
        kind = jax.devices()[0].device_kind.lower()
    except Exception:
        pass
    cap = 2048 if "v5" in kind else 4096          # v5e: 16 MiB scoped VMEM default
    cores = 2 if ("v7" in kind or "7x" in kind) else 1  # v7x: 2 TCs/chip
    return cap, cores


def _pick_tile(B, *, cap, cores):
    """Single big tile on 1-TC parts; even, 8-aligned split on multi-TC parts."""
    if cores <= 1 or B < 16:
        return min(B, cap)  # full-extent tile is legal even if B % 8 != 0
    steps = max(cores, pl.cdiv(B, cap))
    steps = ((steps + cores - 1) // cores) * cores  # even per-core step count
    tm = -(-B // steps)
    tm = ((tm + 7) // 8) * 8
    return min(tm, B)


def mlp_generator_forward(x, prep, *, tm=None):
    """x: (B, input_size) float32. prep: output of prepare_params()."""
    B, in_dim = x.shape
    out_dim = prep["w3"].shape[1]  # 32

    if tm is None:
        cap, cores = _tpu_generation_hints()
        tm = _pick_tile(B, cap=cap, cores=cores)

    grid = (pl.cdiv(B, tm),)
    full = lambda a: pl.BlockSpec(a.shape, lambda i: (0,) * a.ndim)

    return pl.pallas_call(
        mlp_generator_kernel,
        out_shape=jax.ShapeDtypeStruct((B, out_dim), x.dtype),
        grid_spec=pl.GridSpec(
            grid=grid,
            in_specs=[
                pl.BlockSpec((tm, in_dim), lambda i: (i, 0)),  # x tile (streamed)
                full(prep["w1"]), full(prep["b1"]),
                full(prep["w2"]), full(prep["b2"]),
                full(prep["w3"]), full(prep["b3"]),
            ],
            out_specs=pl.BlockSpec((tm, out_dim), lambda i: (i, 0)),
        ),
        compiler_params=pltpu.CompilerParams(
            dimension_semantics=("parallel",)),
    )(x, prep["w1"], prep["b1"], prep["w2"], prep["b2"], prep["w3"], prep["b3"])


def init_params(key, input_size=16):
    """Deterministic synthetic parameters matching nn.Linear init/shapes.

    PyTorch Linear(in, out) stores weight (out, in); we store the transpose
    (in, out) so the kernel does x @ W + b. Biases kept 2D (1, out)."""
    ks = jax.random.split(key, 6)

    def linear(kw, kb, fan_in, fan_out):
        bound = 1.0 / jnp.sqrt(fan_in)
        w = jax.random.uniform(kw, (fan_in, fan_out), jnp.float32, -bound, bound)
        b = jax.random.uniform(kb, (1, fan_out), jnp.float32, -bound, bound)
        return w, b

    w1, b1 = linear(ks[0], ks[1], input_size, 100)
    w2, b2 = linear(ks[2], ks[3], 100, 100)
    w3, b3 = linear(ks[4], ks[5], 100, 32)
    return {"w1": w1, "b1": b1, "w2": w2, "b2": b2, "w3": w3, "b3": b3}


def reference_forward(x, p):
    """Pure-JAX f32 reference of the PyTorch forward."""
    xn = x / jnp.maximum(
        jnp.sqrt(jnp.sum(x * x, axis=-1, keepdims=True)), 1e-12)
    h = xn @ p["w1"] + p["b1"]
    h = jnp.where(h > 0, h, 0.01 * h)
    h = h @ p["w2"] + p["b2"]
    h = jnp.where(h > 0, h, 0.01 * h)
    h = h @ p["w3"] + p["b3"]
    return jnp.tanh(h)


if __name__ == "__main__":
    key = jax.random.PRNGKey(0)
    k_x, k_x2, k_x3, k_p = jax.random.split(key, 4)

    INPUT_SIZE = 16
    params = init_params(k_p, input_size=INPUT_SIZE)
    prep = prepare_params(params)  # pad/cast once, reuse across calls

    # Small single-tile case.
    B = 8
    x = jax.random.normal(k_x, (B, INPUT_SIZE), dtype=jnp.float32)
    out = jax.block_until_ready(mlp_generator_forward(x, prep))
    ref = reference_forward(x, params)
    assert out.shape == (B, 32)
    # Tolerance loosened vs. pure-f32 because layers 2/3 run in bf16 on the MXU.
    assert jnp.allclose(out, ref, atol=2e-2, rtol=2e-2), float(
        jnp.max(jnp.abs(out - ref)))

    # Medium case (auto tile selection).
    B2 = 64
    x2 = jax.random.normal(k_x2, (B2, INPUT_SIZE), dtype=jnp.float32)
    out2 = jax.block_until_ready(mlp_generator_forward(x2, prep))
    ref2 = reference_forward(x2, params)
    assert out2.shape == (B2, 32)
    assert jnp.allclose(out2, ref2, atol=2e-2, rtol=2e-2), float(
        jnp.max(jnp.abs(out2 - ref2)))

    # Non-multiple batch with a forced small tile: exercises the partial final
    # grid block (masked output writeback) path.
    B3 = 70
    x3 = jax.random.normal(k_x3, (B3, INPUT_SIZE), dtype=jnp.float32)
    out3 = jax.block_until_ready(mlp_generator_forward(x3, prep, tm=32))
    ref3 = reference_forward(x3, params)
    assert out3.shape == (B3, 32)
    assert jnp.allclose(out3, ref3, atol=2e-2, rtol=2e-2), float(
        jnp.max(jnp.abs(out3 - ref3)))

    print("KERNEL_OK")
</pallas_src>

<mosaic_0001>
module attributes {stable_mosaic.version = 11 : i64} {
  func.func @mlp_generator_kernel(%arg0: i32, %arg1: memref<8x16xf32, #tpu.memory_space<vmem>>, %arg2: memref<16x128xf32, #tpu.memory_space<vmem>>, %arg3: memref<1x128xf32, #tpu.memory_space<vmem>>, %arg4: memref<128x128xbf16, #tpu.memory_space<vmem>>, %arg5: memref<1x128xf32, #tpu.memory_space<vmem>>, %arg6: memref<128x32xbf16, #tpu.memory_space<vmem>>, %arg7: memref<1x32xf32, #tpu.memory_space<vmem>>, %arg8: memref<8x32xf32, #tpu.memory_space<vmem>>) attributes {dimension_semantics = [#tpu.dimension_semantics<parallel>], iteration_bounds = array<i64: 1>, scalar_prefetch = 0 : i64, scratch_operands = 0 : i64, tpu.core_type = #tpu.core_type<tc>, window_params = [{transform_indices = @transform_0, window_bounds = array<i64: 8, 16>}, {pipeline_mode = #tpu.pipeline_mode<synchronous>, transform_indices = @transform_1, window_bounds = array<i64: 16, 128>}, {pipeline_mode = #tpu.pipeline_mode<synchronous>, transform_indices = @transform_2, window_bounds = array<i64: 1, 128>}, {pipeline_mode = #tpu.pipeline_mode<synchronous>, transform_indices = @transform_3, window_bounds = array<i64: 128, 128>}, {pipeline_mode = #tpu.pipeline_mode<synchronous>, transform_indices = @transform_4, window_bounds = array<i64: 1, 128>}, {pipeline_mode = #tpu.pipeline_mode<synchronous>, transform_indices = @transform_5, window_bounds = array<i64: 128, 32>}, {pipeline_mode = #tpu.pipeline_mode<synchronous>, transform_indices = @transform_6, window_bounds = array<i64: 1, 32>}, {transform_indices = @transform_7, window_bounds = array<i64: 8, 32>}]} {
    %c0 = arith.constant 0 : index
    %c0_0 = arith.constant 0 : index
    %0 = vector.load %arg1[%c0, %c0_0] : memref<8x16xf32, #tpu.memory_space<vmem>>, vector<8x16xf32>
    %1 = arith.mulf %0, %0 : vector<8x16xf32>
    %cst = arith.constant dense<0.000000e+00> : vector<8xf32>
    %2 = vector.multi_reduction <add>, %1, %cst [1] : vector<8x16xf32> to vector<8xf32>
    %3 = vector.shape_cast %2 : vector<8xf32> to vector<8x1xf32>
    %cst_1 = arith.constant 1.000000e-24 : f32
    %4 = vector.broadcast %cst_1 : f32 to vector<8x1xf32>
    %5 = arith.maximumf %3, %4 : vector<8x1xf32>
    %6 = math.rsqrt %5 : vector<8x1xf32>
    %7 = vector.broadcast %6 : vector<8x1xf32> to vector<8x16xf32>
    %8 = arith.mulf %0, %7 : vector<8x16xf32>
    %c0_2 = arith.constant 0 : index
    %c0_3 = arith.constant 0 : index
    %9 = vector.load %arg2[%c0_2, %c0_3] : memref<16x128xf32, #tpu.memory_space<vmem>>, vector<16x128xf32>
    %cst_4 = arith.constant dense<0.000000e+00> : vector<8x128xf32>
    %10 = tpu.matmul %8, %9, %cst_4 {dimension_numbers = #tpu.dot_dimension_numbers<[1], [0], [0], [1], [0, 0, 1, 1], [], []>} : vector<8x16xf32>, vector<16x128xf32>, vector<8x128xf32> -> vector<8x128xf32>
    %c0_5 = arith.constant 0 : index
    %c0_6 = arith.constant 0 : index
    %11 = vector.load %arg3[%c0_5, %c0_6] : memref<1x128xf32, #tpu.memory_space<vmem>>, vector<1x128xf32>
    %12 = vector.broadcast %11 : vector<1x128xf32> to vector<8x128xf32>
    %13 = arith.addf %10, %12 : vector<8x128xf32>
    %cst_7 = arith.constant 0.000000e+00 : f32
    %14 = vector.broadcast %cst_7 : f32 to vector<8x128xf32>
    %15 = arith.cmpf ogt, %13, %14 : vector<8x128xf32>
    %cst_8 = arith.constant 0.00999999977 : f32
    %16 = vector.broadcast %cst_8 : f32 to vector<8x128xf32>
    %17 = arith.mulf %16, %13 : vector<8x128xf32>
    %18 = arith.select %15, %13, %17 : vector<8x128xi1>, vector<8x128xf32>
    %19 = arith.truncf %18 : vector<8x128xf32> to vector<8x128xbf16>
    %c0_9 = arith.constant 0 : index
    %c0_10 = arith.constant 0 : index
    %20 = vector.load %arg4[%c0_9, %c0_10] : memref<128x128xbf16, #tpu.memory_space<vmem>>, vector<128x128xbf16>
    %cst_11 = arith.constant dense<0.000000e+00> : vector<8x128xf32>
    %21 = tpu.matmul %19, %20, %cst_11 {dimension_numbers = #tpu.dot_dimension_numbers<[1], [0], [0], [1], [0, 0, 1, 1], [], []>} : vector<8x128xbf16>, vector<128x128xbf16>, vector<8x128xf32> -> vector<8x128xf32>
    %c0_12 = arith.constant 0 : index
    %c0_13 = arith.constant 0 : index
    %22 = vector.load %arg5[%c0_12, %c0_13] : memref<1x128xf32, #tpu.memory_space<vmem>>, vector<1x128xf32>
    %23 = vector.broadcast %22 : vector<1x128xf32> to vector<8x128xf32>
    %24 = arith.addf %21, %23 : vector<8x128xf32>
    %cst_14 = arith.constant 0.000000e+00 : f32
    %25 = vector.broadcast %cst_14 : f32 to vector<8x128xf32>
    %26 = arith.cmpf ogt, %24, %25 : vector<8x128xf32>
    %cst_15 = arith.constant 0.00999999977 : f32
    %27 = vector.broadcast %cst_15 : f32 to vector<8x128xf32>
    %28 = arith.mulf %27, %24 : vector<8x128xf32>
    %29 = arith.select %26, %24, %28 : vector<8x128xi1>, vector<8x128xf32>
    %30 = arith.truncf %29 : vector<8x128xf32> to vector<8x128xbf16>
    %c0_16 = arith.constant 0 : index
    %c0_17 = arith.constant 0 : index
    %31 = vector.load %arg6[%c0_16, %c0_17] : memref<128x32xbf16, #tpu.memory_space<vmem>>, vector<128x32xbf16>
    %cst_18 = arith.constant dense<0.000000e+00> : vector<8x32xf32>
    %32 = tpu.matmul %30, %31, %cst_18 {dimension_numbers = #tpu.dot_dimension_numbers<[1], [0], [0], [1], [0, 0, 1, 1], [], []>} : vector<8x128xbf16>, vector<128x32xbf16>, vector<8x32xf32> -> vector<8x32xf32>
    %c0_19 = arith.constant 0 : index
    %c0_20 = arith.constant 0 : index
    %33 = vector.load %arg7[%c0_19, %c0_20] : memref<1x32xf32, #tpu.memory_space<vmem>>, vector<1x32xf32>
    %34 = vector.broadcast %33 : vector<1x32xf32> to vector<8x32xf32>
    %35 = arith.addf %32, %34 : vector<8x32xf32>
    %36 = math.tanh %35 : vector<8x32xf32>
    %c0_21 = arith.constant 0 : index
    %c0_22 = arith.constant 0 : index
    %37 = vector.load %arg8[%c0_21, %c0_22] : memref<8x32xf32, #tpu.memory_space<vmem>>, vector<8x32xf32>
    tpu.vector_store %arg8[%c0_21, %c0_22], %36 {strides = array<i32>} : memref<8x32xf32, #tpu.memory_space<vmem>>, vector<8x32xf32>,
    return
  }
  func.func @transform_0(%arg0: i32) -> (i32, i32) {
    %c0_i32 = arith.constant 0 : i32
    %c0_i32_0 = arith.constant 0 : i32
    return %arg0, %c0_i32 : i32, i32
  }
  func.func @transform_1(%arg0: i32) -> (i32, i32) {
    %c0_i32 = arith.constant 0 : i32
    %c0_i32_0 = arith.constant 0 : i32
    %c0_i32_1 = arith.constant 0 : i32
    return %c0_i32, %c0_i32_0 : i32, i32
  }
  func.func @transform_2(%arg0: i32) -> (i32, i32) {
    %c0_i32 = arith.constant 0 : i32
    %c0_i32_0 = arith.constant 0 : i32
    %c0_i32_1 = arith.constant 0 : i32
    return %c0_i32, %c0_i32_0 : i32, i32
  }
  func.func @transform_3(%arg0: i32) -> (i32, i32) {
    %c0_i32 = arith.constant 0 : i32
    %c0_i32_0 = arith.constant 0 : i32
    %c0_i32_1 = arith.constant 0 : i32
    return %c0_i32, %c0_i32_0 : i32, i32
  }
  func.func @transform_4(%arg0: i32) -> (i32, i32) {
    %c0_i32 = arith.constant 0 : i32
    %c0_i32_0 = arith.constant 0 : i32
    %c0_i32_1 = arith.constant 0 : i32
    return %c0_i32, %c0_i32_0 : i32, i32
  }
  func.func @transform_5(%arg0: i32) -> (i32, i32) {
    %c0_i32 = arith.constant 0 : i32
    %c0_i32_0 = arith.constant 0 : i32
    %c0_i32_1 = arith.constant 0 : i32
    return %c0_i32, %c0_i32_0 : i32, i32
  }
  func.func @transform_6(%arg0: i32) -> (i32, i32) {
    %c0_i32 = arith.constant 0 : i32
    %c0_i32_0 = arith.constant 0 : i32
    %c0_i32_1 = arith.constant 0 : i32
    return %c0_i32, %c0_i32_0 : i32, i32
  }
  func.func @transform_7(%arg0: i32) -> (i32, i32) {
    %c0_i32 = arith.constant 0 : i32
    %c0_i32_0 = arith.constant 0 : i32
    return %arg0, %c0_i32 : i32, i32
  }
}

</mosaic_0001>

<bundles_post_ra>
// kernel: tpu_custom_call.1
= control target key start
LH: loop header
LB: loop body
LE: loop exit
PB: predicated region body
PF: predicated region fallthrough
CT: control target
= control target key end

     0   :  { %12 = vsyncpa [#allocation3], 0  ;;  %s674_s0 = inlined_call_operand.hbm [shape: f32[8,16], index: 0, kind: input, shape index: {}]   ;;  %s675_s1 = inlined_call_operand.vmem [shape: f32[16,128], index: 1, kind: input, shape index: {}]   ;;  %s676_s2 = inlined_call_operand.vmem [shape: f32[1,128], index: 2, kind: input, shape index: {}]   ;;  %s677_s3 = inlined_call_operand.vmem [shape: bf16[128,128], index: 3, kind: input, shape index: {}]   ;;  %s678_s4 = inlined_call_operand.vmem [shape: f32[1,128], index: 4, kind: input, shape index: {}]   ;;  %s679_s5 = inlined_call_operand.vmem [shape: bf16[128,32], index: 5, kind: input, shape index: {}]   ;;  %s680_s6 = inlined_call_operand.vmem [shape: f32[1,32], index: 6, kind: input, shape index: {}]   ;;  %s681_s7 = inlined_call_operand.hbm [shape: f32[8,32], index: 7, kind: output, shape index: {}]  }
   0x1   :  { %13 = vsyncpa [#allocation4], 0  ;;  %s535_s24 = smov [#allocation2]  }
   0x2   :  { %s20_s25 = sshll.u32 %s535_s24, 4  ;;  %s21_s25 = int_to_ptr.vmem [resolvable:$true] %s20_s25 }
   0x3   :  { %s499_s26 = scalar_lea.vmem %s21_s25, 128  ;;  %p504_p1 = scmp.lt.s32.totalorder %s21_s25, %s21_s25 }
   0x4   :  { %p500_p0 = scmp.ne.s32.totalorder %s21_s25, %s499_s26  ;;  %p505_p2 = scmp.lt.s32.totalorder %s499_s26, %s499_s26 }
   0x6   :  { %p506_p3 = por %p505_p2, %p504_p1 }
   0x8   :  { %p507_p4 = pnand %p506_p3, %p500_p0 }
   0xa   :  { %510 = shalt.err (!%p507_p4)
}
   0xb   :  { %23 = dma.hbm_to_vmem [thread:$0]  %s674_s0, 128, %s21_s25, [#allocation3]  }
   0xc   :  { %531 = dma.done.wait [#allocation3], 128  }
   0xd   :  { %532 = vsyncadd [#allocation3], 4294967168  ;;  %v40_v0 = vld [vmem:[#allocation2] sm:$0xff]  ;;  %vm42_vm0 = vcmask 130048   ;;  %v50_v3 = vld [vmem:[%s675_s1 + $0x8] sm:$0xff]  ;;  %v536_v4 = vmov 0.0  }
   0xe   :  { %v41_v1 = vmul.f32 %v40_v0, %v40_v0  ;;  %420 = vmatprep.subr.mxu0 %v536_v4  ;;  %v49_v5 = vld [vmem:[%s675_s1] sm:$0xff]  ;;  %vm537_vm1 = vmmov 0   ;;  %427 = vmatprep.subr.bf16.mxu1 %v536_v4  ;;  %v471_v6 = vld [vmem:[%s677_s3 + $0x38] sm:$0xff]   ;;  %v472_v7 = vld [vmem:[%s677_s3 + $0x30] sm:$0xff]   ;;  %vm362_vm4 = vcmask 261120  }
   0xf   :  { %424 = vmatprep.mubr.msk.f32.mxu0 %vm537_vm1, %v536_v4  ;;  %421 = vmatpush3.msra.mxu0 %v50_v3  ;;  %v473_v8 = vld [vmem:[%s677_s3 + $0x28] sm:$0xff]   ;;  %v474_v9 = vld [vmem:[%s677_s3 + $0x20] sm:$0xff]   ;;  %v475_v10 = vld [vmem:[%s677_s3 + $0x18] sm:$0xff]  }
  0x10   :  { %v43_v2 = vsel %vm42_vm0, %v41_v1, 0.0  ;;  %422 = vmatprep.subr.mxu0 %v536_v4  ;;  %443 = vmatprep.mubr.msk.bf16.mxu1 %vm537_vm1, %v536_v4  ;;  %v476_v11 = vld [vmem:[%s677_s3 + $0x10] sm:$0xff]   ;;  %v477_v16 = vld [vmem:[%s677_s3 + $0x8] sm:$0xff]   ;;  %v478_v17 = vld [vmem:[%s677_s3] sm:$0xff]  }
  0x11   :  { %44 = vadd.xlane.f32.xlu0 %v43_v2  ;;  %423 = vmatpush3.msra.mxu0 %v49_v5  ;;  %v479_v18 = vld [vmem:[%s679_s5 + $0x38] sm:$0xff]   ;;  %v480_v19 = vld [vmem:[%s679_s5 + $0x30] sm:$0xff]   ;;  %v481_v20 = vld [vmem:[%s679_s5 + $0x28] sm:$0xff]  }
  0x12   :  { %447 = vmatprep.subr.bf16.mxu0 %v536_v4  ;;  %428 = vmatpush3.bf16.msra.mxu1 %v471_v6  ;;  %v482_v21 = vld [vmem:[%s679_s5 + $0x20] sm:$0xff]   ;;  %v483_v22 = vld [vmem:[%s679_s5 + $0x18] sm:$0xff]   ;;  %v484_v23 = vld [vmem:[%s679_s5 + $0x10] sm:$0xff]  }
  0x13   :  { %429 = vmatprep.subr.bf16.mxu1 %v536_v4  ;;  %v379_v24 = vld [vmem:[%s676_s2] ss:$0 sm:$0xff]  ;;  %v485_v31 = vld [vmem:[%s679_s5 + $0x8] sm:$0xff]  }
  0x14   :  { %v486_v32 = vld [vmem:[%s679_s5] sm:$0xff]  }
  0x15   :  { %v381_v33 = vld [vmem:[%s678_s4] ss:$0 sm:$0xff]  ;;  %s538_s4 = smov [#allocation5]  }
  0x16   :  { %430 = vmatpush3.bf16.msra.mxu1 %v472_v7  ;;  %v390_v42 = vld [vmem:[%s680_s6] ss:$0 sm:$0xff]  ;;  %s370_s5 = sshll.u32 %s538_s4, 4  ;;  %s371_s5 = int_to_ptr.vmem [resolvable:$true] %s370_s5 }
  0x17   :  { %431 = vmatprep.subr.bf16.mxu1 %v536_v4  ;;  %s511_s19 = scalar_lea.vmem %s371_s5, 128  ;;  %p516_p6 = scmp.lt.s32.totalorder %s371_s5, %s371_s5 }
  0x18   :  { %p512_p5 = scmp.ne.s32.totalorder %s371_s5, %s511_s19  ;;  %p517_p7 = scmp.lt.s32.totalorder %s511_s19, %s511_s19 }
  0x1a   :  { %432 = vmatpush3.bf16.msra.mxu1 %v473_v8  ;;  %p518_p8 = por %p517_p7, %p516_p6 }
  0x1b   :  { %433 = vmatprep.subr.bf16.mxu1 %v536_v4 }
  0x1c   :  { %p519_p9 = pnand %p518_p8, %p512_p5 }
  0x1e   :  { %434 = vmatpush3.bf16.msra.mxu1 %v474_v9 }
  0x1f   :  { %435 = vmatprep.subr.bf16.mxu1 %v536_v4 }
  0x22   :  { %436 = vmatpush3.bf16.msra.mxu1 %v475_v10 }
  0x23   :  { %437 = vmatprep.subr.bf16.mxu1 %v536_v4 }
  0x26   :  { %438 = vmatpush3.bf16.msra.mxu1 %v476_v11 }
  0x27   :  { %439 = vmatprep.subr.bf16.mxu1 %v536_v4 }
  0x2a   :  { %440 = vmatpush3.bf16.msra.mxu1 %v477_v16 }
  0x2b   :  { %441 = vmatprep.subr.bf16.mxu1 %v536_v4 }
  0x2e   :  { %442 = vmatpush3.bf16.msra.mxu1 %v478_v17 }
  0x9a   :  { %v45_v12 = vpop.xlane.xlu0 %44 }
  0x9b   :  { %v46_v13 = vmax.f32 %v45_v12, 1e-24 }
  0x9d   :  { %487 = vrsqrt.f32 %v46_v13 }
  0xaa   :  { %v488_v14 = vpop.eup %487 }
  0xab   :  { %v48_v15 = vmul.f32 %v488_v14, %v40_v0 }
  0xad   :  { %425 = vmatmul.mubr.msk.f32.vlgmr.msra.gmra.mxu0 %vm42_vm0, %v48_v15 }
  0xae   :  { %463 = vmatprep.mubr.msk.bf16.mxu0 %vm537_vm1, %v536_v4  ;;  %448 = vmatpush3.bf16.msra.mxu0 %v479_v18 }
  0xaf   :  { %449 = vmatprep.subr.bf16.mxu0 %v536_v4 }
  0xb2   :  { %450 = vmatpush3.bf16.msra.mxu0 %v480_v19 }
  0xb3   :  { %451 = vmatprep.subr.bf16.mxu0 %v536_v4 }
  0xb6   :  { %452 = vmatpush3.bf16.msra.mxu0 %v481_v20 }
  0xb7   :  { %453 = vmatprep.subr.bf16.mxu0 %v536_v4 }
  0xba   :  { %454 = vmatpush3.bf16.msra.mxu0 %v482_v21 }
  0xbb   :  { %455 = vmatprep.subr.bf16.mxu0 %v536_v4 }
  0xbe   :  { %456 = vmatpush3.bf16.msra.mxu0 %v483_v22 }
  0xbf   :  { %457 = vmatprep.subr.bf16.mxu0 %v536_v4 }
  0xc2   :  { %458 = vmatpush3.bf16.msra.mxu0 %v484_v23 }
  0xc3   :  { %459 = vmatprep.subr.bf16.mxu0 %v536_v4 }
  0xc6   :  { %460 = vmatpush3.bf16.msra.mxu0 %v485_v31 }
  0xc7   :  { %461 = vmatprep.subr.bf16.mxu0 %v536_v4 }
  0xca   :  { %462 = vmatpush3.bf16.msra.mxu0 %v486_v32 }
 0x16d   :  { %v127_v25 = vpop.f32.mrf.mxu0 }
 0x16e   :  { %v128_v26 = vadd.f32 %v379_v24, %v127_v25 }
 0x16f   :  { %v426_v27 = vpop.f32.mrf.mxu0 }
 0x170   :  { %vm131_vm2 = vcmp.gt.f32.partialorder %v128_v26, 0.0  ;;  %v132_v28 = vmul.f32 0.01, %v128_v26 }
 0x172   :  { %v133_v29 = vsel %vm131_vm2, %v128_v26, %v132_v28 }
 0x173   :  { %v134_v30 = vpack.c.bf16 %v133_v29, %v133_v29 }
 0x175   :  { %444 = vmatmul.mubr.bf16.vlgmr.msra.gmra.mxu1 %v134_v30 }
 0x235   :  { %v240_v34 = vpop.f32.mrf.mxu1 }
 0x236   :  { %v241_v35 = vadd.f32 %v381_v33, %v240_v34 }
 0x237   :  { %v445_v36 = vpop.f32.mrf.mxu1 }
 0x238   :  { %vm246_vm3 = vcmp.gt.f32.partialorder %v241_v35, 0.0  ;;  %v247_v37 = vmul.f32 0.01, %v241_v35 }
 0x239   :  { %v243_v38 = vpop.f32.mrf.mxu1 }
 0x23a   :  { %v248_v39 = vsel %vm246_vm3, %v241_v35, %v247_v37 }
 0x23b   :  { %v249_v40 = vpack.c.bf16 %v248_v39, %v248_v39  ;;  %v446_v41 = vpop.f32.mrf.mxu1 }
 0x23d   :  { %464 = vmatmul.mubr.bf16.vlgmr.msra.gmra.mxu0 %v249_v40 }
 0x2fd   :  { %v355_v43 = vpop.f32.mrf.mxu0 }
 0x2fe   :  { %v356_v44 = vadd.f32 %v390_v42, %v355_v43 }
 0x2ff   :  { %v465_v45 = vpop.f32.mrf.mxu0 }
 0x300   :  { %489 = vtanh.f32 %v356_v44 }
 0x301   :  { %v358_v46 = vpop.f32.mrf.mxu0 }
 0x303   :  { %v466_v47 = vpop.f32.mrf.mxu0 }
 0x30d   :  { %v490_v48 = vpop.eup %489 }
 0x30e   :  { %363 = vst.msk [vmem:[#allocation5] sm:$0xff] %vm362_vm4, %v490_v48 }
 0x30f   :  { %522 = shalt.err (!%p519_p9)
}
 0x310   :  { %373 = dma.vmem_to_hbm [thread:$0]  %s371_s5, 128, %s681_s7, [#allocation4]  }
 0x311   :  { %533 = dma.done.wait [#allocation4], 128  }
 0x312   :  { %534 = vsyncadd [#allocation4], 4294967168 }
 0x313   :  { %377 = vsyncpa [#allocation3], 1 }
 0x314   :  { %378 = vsyncpa [#allocation4], 1 }

</bundles_post_ra>
